<compile_context>
chip_gen: v6e
topology: v6e:2x2x1
jax: 0.10.0
libtpu: 0.0.40
codegen_flags: <defaults>
</compile_context>

<pallas_src>
import functools

import jax
import jax.numpy as jnp
from jax import lax
from jax.experimental import pallas as pl
from jax.experimental.pallas import tpu as pltpu


def _cdiv(a, b):
    return -(-a // b)


def _round_up(a, b):
    return _cdiv(a, b) * b


def _vmem_capacity_bytes():
    try:
        return int(pltpu.get_tpu_info().vmem_capacity_bytes)
    except Exception:
        return 64 * 1024 * 1024  # conservative (v7x-sized) fallback


def _focal_partial_kernel(logits_ref, aux_ref, out_ref, *, n_rows, tiles_per_shard):
    """Accumulates the masked-NLL partial sum of one shard into out_ref.

    logits_ref : (TILE_N, C)  native dtype (bf16/f32) -- class dim on lanes
    aux_ref    : (TILE_N, 2)  f32, [:, 0] = target id, [:, 1] = confidence mask
    out_ref    : (1, 8, 128)  f32 lane-dense per-shard accumulator
                 (same block for every step of the reduction axis)
    """
    s = pl.program_id(0)
    i = pl.program_id(1)

    @pl.when(i == 0)
    def _():
        out_ref[...] = jnp.zeros_like(out_ref)

    logits = logits_ref[...]                                                 # (TILE_N, C)
    tn, c = logits.shape

    # Row max in the native dtype (exact), shift / exp in f32 for precision.
    row_max = jnp.max(logits, axis=-1, keepdims=True)                        # (TILE_N, 1)
    shifted = logits.astype(jnp.float32) - row_max.astype(jnp.float32)       # (TILE_N, C) f32
    sum_exp = jnp.sum(jnp.exp(shifted), axis=-1, keepdims=True)              # (TILE_N, 1)

    # Target logit via lane-iota select on the shifted values; row_max cancels:
    #   nll = lse - logits[tgt] = log(sum_exp) - shifted[tgt]
    tgt = aux_ref[:, 0:1].astype(jnp.int32)                                  # (TILE_N, 1)
    conf = aux_ref[:, 1:2]                                                   # (TILE_N, 1)
    lane_ids = lax.broadcasted_iota(jnp.int32, (tn, c), 1)
    tgt_shifted = jnp.sum(jnp.where(lane_ids == tgt, shifted, 0.0),
                          axis=-1, keepdims=True)                            # (TILE_N, 1)

    nll = (jnp.log(sum_exp) - tgt_shifted) * conf                            # (TILE_N, 1)

    # Ragged tail: rows past the true N hold garbage (possibly NaN/Inf) -> select
    # them out (NaN * 0 would poison a multiply-based mask).
    g = s * tiles_per_shard + i                                              # global tile idx
    row_ids = g * tn + lax.broadcasted_iota(jnp.int32, (tn, 1), 0)
    contrib = jnp.where(row_ids < n_rows, nll, 0.0)

    out_ref[...] = out_ref[...] + jnp.sum(contrib)


def focal_loss_pallas(logits, targets, gamma=2.0, mask=None, *,
                      tile_n=None, num_shards=None):
    """FocalLoss(alpha=None, gamma, reduction='mean')(logits, targets, name='ce', mask)."""
    n, c = logits.shape
    if mask is None:
        mask = jnp.ones((n,), jnp.float32)

    itemsize = jnp.dtype(logits.dtype).itemsize
    sub_mult = max(8, 32 // itemsize)          # dtype sublane multiple: 8 f32, 16 bf16, 32 i8
    c_lanes = _round_up(c, 128)                # lane-padded class extent in VMEM

    # --- Generation-aware VMEM budget (v5e/v6e: 128 MiB physical; v7x: 64 MiB per TC).
    vmem_cap = _vmem_capacity_bytes()
    if vmem_cap >= 100 * 1024 * 1024:
        vmem_limit = 96 * 1024 * 1024
        default_shards = 1                     # single TensorCore per chip (v5e/v6e)
    else:
        vmem_limit = 44 * 1024 * 1024
        default_shards = 2                     # v7x: split rows across the 2 TCs

    # --- Tile sizing: charge the double-buffered (lane-padded) logits tile, ~4x C of
    #     live f32/i32 temporaries, and the double-buffered lane-padded aux column
    #     against ~60% of the scoped-VMEM limit.
    per_row_bytes = 2 * c_lanes * itemsize + 4 * c_lanes * 4 + 2 * 128 * 4
    if tile_n is None:
        tile_n = int(vmem_limit * 0.6) // per_row_bytes
    tile_n = max(sub_mult, (int(tile_n) // sub_mult) * sub_mult)
    tile_n = min(tile_n, max(8, (n // 8) * 8))  # never meaningfully exceed the array

    n_tiles = _cdiv(n, tile_n)
    if num_shards is None:
        num_shards = default_shards
    num_shards = max(1, min(int(num_shards), n_tiles))
    tiles_per_shard = _cdiv(n_tiles, num_shards)
    last_block = n_tiles - 1

    # Pack (target, mask) into a single f32 column pair: one narrow DMA per tile
    # instead of two, and no host-side copy of the logits at all.
    aux = jnp.stack(
        [targets.astype(jnp.float32), mask.astype(jnp.float32)], axis=-1)    # (N, 2)

    tps = tiles_per_shard

    def row_block(s, i, tps=tps, last=last_block):
        g = s * tps + i
        return (jnp.minimum(g, last), 0)        # clamp fully-OOB tiles in-bounds

    cost = pl.CostEstimate(
        flops=7 * n * c,
        transcendentals=n * c + n,
        bytes_accessed=n * c * itemsize + n * 2 * 4 + num_shards * 8 * 128 * 4,
    )

    kernel = functools.partial(_focal_partial_kernel, n_rows=n, tiles_per_shard=tps)

    out = pl.pallas_call(
        kernel,
        out_shape=jax.ShapeDtypeStruct((num_shards, 8, 128), jnp.float32),
        grid=(num_shards, tiles_per_shard),
        in_specs=[
            pl.BlockSpec((tile_n, c), row_block),   # logits tile (native dtype)
            pl.BlockSpec((tile_n, 2), row_block),   # packed (target, mask) columns
        ],
        out_specs=pl.BlockSpec((1, 8, 128), lambda s, i: (s, 0, 0)),
        compiler_params=pltpu.CompilerParams(
            # TODO(synk): if an xprof on v7x shows one TC idle, switch axis 0 to
            #             pltpu.CORE_PARALLEL (grid dim 0 must equal the core count).
            dimension_semantics=("parallel", "arbitrary"),
            vmem_limit_bytes=vmem_limit,
        ),
        cost_estimate=cost,
    )(logits, aux)

    # Scalar finalize in the wrapper (essentially free).
    partial_sum = jnp.sum(out[:, 0, 0])
    ce = partial_sum / jnp.float32(n)            # mean over the ORIGINAL N
    t = 1.0 - jnp.exp(-ce)
    g = float(gamma)
    if g == int(g) and 0 <= int(g) <= 4:
        # Integer gamma: explicit multiplies (avoids log/exp pow and log(0) corner).
        w = jnp.float32(1.0)
        for _ in range(int(g)):
            w = w * t
    else:
        w = t ** g
    return w * ce


def _focal_loss_ref(logits, targets, gamma=2.0, mask=None):
    """Plain-JAX reference matching the PyTorch module's default path."""
    n = logits.shape[0]
    if mask is None:
        mask = jnp.ones((n,), jnp.float32)
    logits = logits.astype(jnp.float32)
    lse = jax.nn.logsumexp(logits, axis=-1)
    tgt = jnp.take_along_axis(logits, targets.reshape(n, 1), axis=-1)[:, 0]
    ce = jnp.mean((lse - tgt) * mask)
    return (1.0 - jnp.exp(-ce)) ** gamma * ce


if __name__ == "__main__":
    key = jax.random.PRNGKey(0)
    k_logits, k_targets, k_mask, k2_logits, k2_targets, k2_mask = jax.random.split(key, 6)

    # --- Small default-path test: batch of 8 unlabeled samples, 16 classes.
    N, C = 8, 16
    logits = jax.random.normal(k_logits, (N, C), dtype=jnp.float32)
    targets = jax.random.randint(k_targets, (N,), 0, C, dtype=jnp.int32)
    mask = (jax.random.uniform(k_mask, (N,)) > 0.3).astype(jnp.float32)

    out = jax.block_until_ready(focal_loss_pallas(logits, targets, gamma=2.0, mask=None))
    ref = _focal_loss_ref(logits, targets, gamma=2.0, mask=None)
    assert jnp.allclose(out, ref, rtol=1e-5, atol=1e-5), (out, ref)

    out_m = jax.block_until_ready(focal_loss_pallas(logits, targets, gamma=2.0, mask=mask))
    ref_m = _focal_loss_ref(logits, targets, gamma=2.0, mask=mask)
    assert jnp.allclose(out_m, ref_m, rtol=1e-5, atol=1e-5), (out_m, ref_m)

    # --- Ragged / multi-tile / 2-shard / bf16 path (N not a multiple of the tile).
    N2, C2 = 300, 256
    logits2 = jax.random.normal(k2_logits, (N2, C2), dtype=jnp.float32).astype(jnp.bfloat16)
    targets2 = jax.random.randint(k2_targets, (N2,), 0, C2, dtype=jnp.int32)
    mask2 = (jax.random.uniform(k2_mask, (N2,)) > 0.3).astype(jnp.float32)

    out2 = jax.block_until_ready(
        focal_loss_pallas(logits2, targets2, gamma=2.0, mask=mask2, tile_n=64, num_shards=2))
    ref2 = _focal_loss_ref(logits2, targets2, gamma=2.0, mask=mask2)
    assert jnp.allclose(out2, ref2, rtol=1e-4, atol=1e-4), (out2, ref2)

    # --- Same ragged bf16 input through the automatic (generation-aware) tiling.
    out3 = jax.block_until_ready(focal_loss_pallas(logits2, targets2, gamma=2.0, mask=mask2))
    assert jnp.allclose(out3, ref2, rtol=1e-4, atol=1e-4), (out3, ref2)

    print("KERNEL_OK")
</pallas_src>

<mosaic_0001>
module attributes {stable_mosaic.version = 11 : i64} {
  func.func @_focal_partial_kernel(%arg0: i32, %arg1: i32, %arg2: memref<8x16xf32, #tpu.memory_space<vmem>>, %arg3: memref<8x2xf32, #tpu.memory_space<vmem>>, %arg4: memref<1x8x128xf32, #tpu.memory_space<vmem>>) attributes {dimension_semantics = [#tpu.dimension_semantics<parallel>, #tpu.dimension_semantics<arbitrary>], iteration_bounds = array<i64: 1, 1>, scalar_prefetch = 0 : i64, scratch_operands = 0 : i64, tpu.core_type = #tpu.core_type<tc>, window_params = [{transform_indices = @transform_0, window_bounds = array<i64: 8, 16>}, {transform_indices = @transform_1, window_bounds = array<i64: 8, 2>}, {transform_indices = @transform_2, window_bounds = array<i64: 1, 8, 128>}]} {
    %c0_i32 = arith.constant 0 : i32
    %0 = arith.cmpi eq, %arg1, %c0_i32 : i32
    %1 = arith.extui %0 : i1 to i32
    %c0_i32_0 = arith.constant 0 : i32
    %2 = arith.cmpi ne, %1, %c0_i32_0 : i32
    scf.if %2 {
      %cst_17 = arith.constant 0.000000e+00 : f32
      %42 = vector.broadcast %cst_17 : f32 to vector<1x8x128xf32>
      %c0_18 = arith.constant 0 : index
      %c0_19 = arith.constant 0 : index
      %c0_20 = arith.constant 0 : index
      %43 = vector.load %arg4[%c0_18, %c0_19, %c0_20] : memref<1x8x128xf32, #tpu.memory_space<vmem>>, vector<1x8x128xf32>
      tpu.vector_store %arg4[%c0_18, %c0_19, %c0_20], %42 {strides = array<i32>} : memref<1x8x128xf32, #tpu.memory_space<vmem>>, vector<1x8x128xf32>,
    } else {
    }
    %c0 = arith.constant 0 : index
    %c0_1 = arith.constant 0 : index
    %3 = vector.load %arg2[%c0, %c0_1] : memref<8x16xf32, #tpu.memory_space<vmem>>, vector<8x16xf32>
    %cst = arith.constant dense<0xFF800000> : vector<8xf32>
    %4 = vector.multi_reduction <maximumf>, %3, %cst [1] : vector<8x16xf32> to vector<8xf32>
    %5 = vector.shape_cast %4 : vector<8xf32> to vector<8x1xf32>
    %6 = vector.broadcast %5 : vector<8x1xf32> to vector<8x16xf32>
    %7 = arith.subf %3, %6 : vector<8x16xf32>
    %8 = math.exp %7 : vector<8x16xf32>
    %cst_2 = arith.constant dense<0.000000e+00> : vector<8xf32>
    %9 = vector.multi_reduction <add>, %8, %cst_2 [1] : vector<8x16xf32> to vector<8xf32>
    %10 = vector.shape_cast %9 : vector<8xf32> to vector<8x1xf32>
    %c0_3 = arith.constant 0 : index
    %c0_4 = arith.constant 0 : index
    %11 = vector.load %arg3[%c0_3, %c0_4] : memref<8x2xf32, #tpu.memory_space<vmem>>, vector<8x1xf32>
    %12 = arith.fptosi %11 : vector<8x1xf32> to vector<8x1xi32>
    %c0_5 = arith.constant 0 : index
    %c1 = arith.constant 1 : index
    %13 = vector.load %arg3[%c0_5, %c1] : memref<8x2xf32, #tpu.memory_space<vmem>>, vector<8x1xf32>
    %14 = tpu.iota {dimensions = array<i32: 1>} : vector<8x16xi32>
    %15 = vector.broadcast %12 : vector<8x1xi32> to vector<8x16xi32>
    %16 = arith.cmpi eq, %14, %15 : vector<8x16xi32>
    %cst_6 = arith.constant 0.000000e+00 : f32
    %17 = vector.broadcast %cst_6 : f32 to vector<8x16xf32>
    %18 = arith.select %16, %7, %17 : vector<8x16xi1>, vector<8x16xf32>
    %cst_7 = arith.constant dense<0.000000e+00> : vector<8xf32>
    %19 = vector.multi_reduction <add>, %18, %cst_7 [1] : vector<8x16xf32> to vector<8xf32>
    %20 = vector.shape_cast %19 : vector<8xf32> to vector<8x1xf32>
    %21 = math.log %10 : vector<8x1xf32>
    %22 = arith.subf %21, %20 : vector<8x1xf32>
    %23 = arith.mulf %22, %13 : vector<8x1xf32>
    %c1_i32 = arith.constant 1 : i32
    %24 = arith.muli %arg0, %c1_i32 : i32
    %25 = arith.addi %24, %arg1 : i32
    %c8_i32 = arith.constant 8 : i32
    %26 = arith.muli %25, %c8_i32 : i32
    %27 = tpu.iota {dimensions = array<i32: 0>} : vector<8x1xi32>
    %28 = vector.broadcast %26 : i32 to vector<8x1xi32>
    %29 = arith.addi %28, %27 : vector<8x1xi32>
    %c8_i32_8 = arith.constant 8 : i32
    %30 = vector.broadcast %c8_i32_8 : i32 to vector<8x1xi32>
    %31 = arith.cmpi slt, %29, %30 : vector<8x1xi32>
    %cst_9 = arith.constant 0.000000e+00 : f32
    %32 = vector.broadcast %cst_9 : f32 to vector<8x1xf32>
    %33 = arith.select %31, %23, %32 : vector<8x1xi1>, vector<8x1xf32>
    %c0_10 = arith.constant 0 : index
    %c0_11 = arith.constant 0 : index
    %c0_12 = arith.constant 0 : index
    %34 = vector.load %arg4[%c0_10, %c0_11, %c0_12] : memref<1x8x128xf32, #tpu.memory_space<vmem>>, vector<1x8x128xf32>
    %35 = vector.shape_cast %33 : vector<8x1xf32> to vector<1x8x1xf32>
    %cst_13 = arith.constant dense<0.000000e+00> : vector<1xf32>
    %36 = vector.multi_reduction <add>, %35, %cst_13 [1, 2] : vector<1x8x1xf32> to vector<1xf32>
    %37 = vector.shape_cast %36 : vector<1xf32> to vector<1x1x1xf32>
    %38 = vector.extract %37[0, 0, 0] : f32 from vector<1x1x1xf32>
    %39 = vector.broadcast %38 : f32 to vector<1x8x128xf32>
    %40 = arith.addf %34, %39 : vector<1x8x128xf32>
    %c0_14 = arith.constant 0 : index
    %c0_15 = arith.constant 0 : index
    %c0_16 = arith.constant 0 : index
    %41 = vector.load %arg4[%c0_14, %c0_15, %c0_16] : memref<1x8x128xf32, #tpu.memory_space<vmem>>, vector<1x8x128xf32>
    tpu.vector_store %arg4[%c0_14, %c0_15, %c0_16], %40 {strides = array<i32>} : memref<1x8x128xf32, #tpu.memory_space<vmem>>, vector<1x8x128xf32>,
    return
  }
  func.func @transform_0(%arg0: i32, %arg1: i32) -> (i32, i32) {
    %c1_i32 = arith.constant 1 : i32
    %0 = arith.muli %arg0, %c1_i32 : i32
    %1 = arith.addi %0, %arg1 : i32
    %c0_i32 = arith.constant 0 : i32
    %2 = arith.minsi %1, %c0_i32 : i32
    %c0_i32_0 = arith.constant 0 : i32
    %c0_i32_1 = arith.constant 0 : i32
    return %2, %c0_i32_0 : i32, i32
  }
  func.func @transform_1(%arg0: i32, %arg1: i32) -> (i32, i32) {
    %c1_i32 = arith.constant 1 : i32
    %0 = arith.muli %arg0, %c1_i32 : i32
    %1 = arith.addi %0, %arg1 : i32
    %c0_i32 = arith.constant 0 : i32
    %2 = arith.minsi %1, %c0_i32 : i32
    %c0_i32_0 = arith.constant 0 : i32
    %c0_i32_1 = arith.constant 0 : i32
    return %2, %c0_i32_0 : i32, i32
  }
  func.func @transform_2(%arg0: i32, %arg1: i32) -> (i32, i32, i32) {
    %c0_i32 = arith.constant 0 : i32
    %c0_i32_0 = arith.constant 0 : i32
    %c0_i32_1 = arith.constant 0 : i32
    return %arg0, %c0_i32, %c0_i32_0 : i32, i32, i32
  }
}

</mosaic_0001>

<bundles_post_ra>
// kernel: tpu_custom_call.1
= control target key start
LH: loop header
LB: loop body
LE: loop exit
PB: predicated region body
PF: predicated region fallthrough
CT: control target
= control target key end

     0   :  { %vm72_vm0 = vcmask 130048   ;;  %s216_s0 = inlined_call_operand.vmem [shape: f32[8,16], index: 0, kind: input, shape index: {}]   ;;  %s217_s1 = inlined_call_operand.vmem [shape: f32[8,2], index: 1, kind: input, shape index: {}]   ;;  %s218_s2 = inlined_call_operand.hbm [shape: f32[1,8,128], index: 2, kind: output, shape index: {}]  }
   0x1   :  { %v71_v0 = vld [vmem:[%s216_s0] sm:$0xff] }
   0x2   :  { %7 = vsyncpa [#allocation3], 0  ;;  %v73_v1 = vsel %vm72_vm0, %v71_v0, -inf  ;;  %v186_v2 = vmov 0   ;;  %v82_v3 = vld [vmem:[%s217_s1] sm:$0xff]  ;;  %v84_v9 = vlaneseq  ;;  %s187_s0 = smov 127  }
   0x3   :  { %159 = vset.pattern.permute.xlu0 %v186_v2  ;;  %v151_v4 = vtrunc.f32 %v82_v3  ;;  %vm111_vm2 = vcmask 7168   ;;  %s188_s1 = smov [#allocation2]  }
   0x4   :  { %74 = vmax.xlane.f32.xlu0 %v73_v1  ;;  %v85_v10 = vand.u32 127, %v84_v9  ;;  %s131_s13 = sshll.u32 %s188_s1, 4  ;;  %s132_s13 = int_to_ptr.vmem [resolvable:$true] %s131_s13 }
   0x5   :  { %v152_v5 = vcvt.f32.s32 %v151_v4  ;;  %s164_s15 = scalar_lea.vmem %s132_s13, 128  ;;  %p169_p1 = scmp.lt.s32.totalorder %s132_s13, %s132_s13 }
   0x6   :  { %p165_p0 = scmp.ne.s32.totalorder %s132_s13, %s164_s15  ;;  %p170_p2 = scmp.lt.s32.totalorder %s164_s15, %s164_s15 }
   0x8   :  { %p171_p3 = por %p170_p2, %p169_p1 }
   0xa   :  { %p172_p4 = pnand %p171_p3, %p165_p0 }
  0x1a   :  { %87 = vperm.xlu0 %159, %v152_v5  }
  0x8d   :  { %v75_v6 = vpop.xlane.xlu0 %74 }
  0x8e   :  { %v76_v7 = vsub.f32 %v71_v0, %v75_v6 }
  0x90   :  { %v77_v8 = vmul.f32 1.442695, %v76_v7 }
  0x92   :  { %160 = vpow2.f32 %v77_v8 }
  0x95   :  { %v88_v11 = vpop.permute.xlu0 %87 }
  0x96   :  { %vm89_vm1 = vcmp.eq.s32.totalorder %v85_v10, %v88_v11 }
  0x97   :  { %v90_v14 = vsel %vm89_vm1, %v76_v7, 0.0 }
  0x98   :  { %v91_v15 = vsel %vm72_vm0, %v90_v14, 0.0 }
  0x9f   :  { %v161_v12 = vpop.eup %160 }
  0xa0   :  { %v79_v13 = vsel %vm72_vm0, %v161_v12, 0.0 }
  0xa1   :  { %80 = vadd.xlane.f32.xlu1 %v79_v13 }
  0xa5   :  { %92 = vadd.xlane.f32.xlu1 %v91_v15 }
 0x12a   :  { %v81_v16 = vpop.xlane.xlu1 %80 }
 0x12b   :  { %162 = vlog2.f32 %v81_v16 }
 0x12e   :  { %v93_v19 = vpop.xlane.xlu1 %92 }
 0x138   :  { %v163_v17 = vpop.eup %162 }
 0x139   :  { %v95_v18 = vmul.f32 0.6931472, %v163_v17 }
 0x13b   :  { %v96_v20 = vsub.f32 %v95_v18, %v93_v19 }
 0x13d   :  { %v97_v21 = vmul.f32 %v96_v20, %v82_v3 }
 0x13f   :  { %108 = vrot.lane.b32.xlu1 %v97_v21, %s187_s0 }
 0x1b1   :  { %v109_v22 = vpop.permute.xlu1 %108 }
 0x1b2   :  { %v112_v23 = vsel %vm111_vm2, %v109_v22, 0.0 }
 0x1b3   :  { %113 = vadd.xlane.f32.xlu1 %v112_v23 }
 0x23c   :  { %v114_v24 = vpop.xlane.xlu1 %113 }
 0x23d   :  { %v115_v25 = vrot.slane %v114_v24, 4 }
 0x23f   :  { %v116_v26 = vadd.f32 %v115_v25, %v114_v24 }
 0x241   :  { %v117_v27 = vrot.slane %v116_v26, 2 }
 0x243   :  { %v118_v28 = vadd.f32 %v117_v27, %v116_v26 }
 0x245   :  { %v119_v29 = vrot.slane %v118_v28, 1 }
 0x247   :  { %v120_v30 = vadd.f32 %v119_v29, %v118_v28 }
 0x249   :  { %153 = vpush %v120_v30 }
 0x27a   :  { %s154_s14 = spop %153 }
 0x27b   :  { %v122_v31 = vstv %s154_s14 }
 0x27c   :  { %124 = vst [vmem:[#allocation2] sm:$0xff] %v122_v31 }
 0x27d   :  { %175 = shalt.err (!%p172_p4)
}
 0x27e   :  { %134 = dma.vmem_to_hbm [thread:$0]  %s132_s13, 128, %s218_s2, [#allocation3]  }
 0x27f   :  { %184 = dma.done.wait [#allocation3], 128  }
 0x280   :  { %185 = vsyncadd [#allocation3], 4294967168 }
 0x281   :  { %138 = vsyncpa [#allocation3], 1 }

</bundles_post_ra>
